<compile_context>
chip_gen: v6e
topology: v6e:2x2x1
jax: 0.10.0
libtpu: 0.0.40
codegen_flags: <defaults>
</compile_context>

<pallas_src>
import jax
import jax.numpy as jnp
from jax.experimental import pallas as pl
from jax.experimental.pallas import tpu as pltpu

PACK = 16                      # batch rows packed into the 128-lane dim
IN_FEATURES = 8
OUT_FEATURES = 8
LANES = PACK * OUT_FEATURES    # 128


def _round_up(n, m):
    return ((n + m - 1) // m) * m


def linear_relu_kernel(x_ref, w_ref, b_ref, o_ref):
    # (TM, 128) @ (128, 128) block-diagonal weight -> (TM, 128), + bias, relu.
    v = jnp.dot(x_ref[...], w_ref[...], preferred_element_type=jnp.float32)
    v = v + b_ref[...]
    o_ref[...] = jnp.maximum(v, 0.0).astype(o_ref.dtype)


def model_forward(x, weight, bias, other, tm=4096, small_batch_threshold=256):
    """x: (B, 8) f32; weight: (8, 8) f32 (out, in) PyTorch convention; bias: (8,)."""
    B, IN = x.shape
    OUT = weight.shape[0]
    assert IN == IN_FEATURES and OUT == OUT_FEATURES

    wt = weight.T.astype(jnp.float32)                    # (IN, OUT) so that y = x @ wt
    b_fused = (bias + jnp.float32(other)).astype(jnp.float32)  # fold scalar `other`

    # Tiny batches: the XLA-fused matmul+add+relu is far cheaper than a
    # custom-call launch + DMA setup.
    if B <= small_batch_threshold:
        return jnp.maximum(x @ wt + b_fused[None, :], 0.0)

    # ---- lane-dense packing: 16 batch rows per 128-lane packed row ----
    rows = pl.cdiv(B, PACK)                 # packed rows needed
    TM = max(8, min(tm, _round_up(rows, 8)))  # tile rows, multiple of 8
    rows_pad = _round_up(rows, TM)          # grid divides evenly
    B_pad = rows_pad * PACK
    if B_pad != B:
        x = jnp.pad(x, ((0, B_pad - B), (0, 0)))
    x_packed = x.reshape(rows_pad, LANES)   # free, contiguous row-major reshape

    # 128x128 block-diagonal weight: PACK copies of W^T on the diagonal.
    w_block = jnp.kron(jnp.eye(PACK, dtype=jnp.float32), wt)      # (128, 128)
    b_tiled = jnp.tile(b_fused, PACK).reshape(1, LANES)           # (1, 128)

    grid = (rows_pad // TM,)

    cost = pl.CostEstimate(
        flops=2 * rows_pad * LANES * LANES,
        transcendentals=0,
        bytes_accessed=4 * (2 * rows_pad * LANES + LANES * LANES + LANES),
    )

    out_packed = pl.pallas_call(
        linear_relu_kernel,
        out_shape=jax.ShapeDtypeStruct((rows_pad, LANES), jnp.float32),
        grid_spec=pltpu.PrefetchScalarGridSpec(
            num_scalar_prefetch=0,
            grid=grid,
            in_specs=[
                pl.BlockSpec((TM, LANES), lambda i: (i, 0)),      # packed x, batch-tiled
                pl.BlockSpec((LANES, LANES), lambda i: (0, 0)),   # block-diag W, resident
                pl.BlockSpec((1, LANES), lambda i: (0, 0)),       # fused bias, resident
            ],
            out_specs=pl.BlockSpec((TM, LANES), lambda i: (i, 0)),
        ),
        compiler_params=pltpu.CompilerParams(
            dimension_semantics=("parallel",),
        ),
        cost_estimate=cost,
    )(x_packed, w_block, b_tiled)

    # Unpack back to the module's (B, OUT) output layout (free reshape + slice).
    return out_packed.reshape(B_pad, OUT)[:B]


if __name__ == "__main__":
    key = jax.random.PRNGKey(0)
    kx, kw, kb, kx2, kx3 = jax.random.split(key, 5)

    IN, OUT = 8, 8
    other = 1.0

    # Deterministic parameter init (mimic PyTorch Linear uniform bounds).
    bound = 1.0 / jnp.sqrt(jnp.float32(IN))
    weight = jax.random.uniform(kw, (OUT, IN), jnp.float32, -bound, bound)
    bias = jax.random.uniform(kb, (OUT,), jnp.float32, -bound, bound)

    def ref(x):
        return jnp.maximum(x @ weight.T + bias + other, 0.0)

    # Case 1: module's literal shape (B=1) -> small-batch fast path.
    x1 = jax.random.normal(kx, (1, IN), jnp.float32)
    out1 = jax.block_until_ready(model_forward(x1, weight, bias, other))
    assert out1.shape == (1, OUT)
    assert jnp.allclose(out1, ref(x1), atol=1e-5), "mismatch vs reference (B=1)"

    # Case 2: batched input exercising the packed, multi-step pipelined path.
    B2 = 4096
    x2 = jax.random.normal(kx2, (B2, IN), jnp.float32)
    out2 = jax.block_until_ready(model_forward(x2, weight, bias, other, tm=128))
    assert out2.shape == (B2, OUT)
    assert jnp.allclose(out2, ref(x2), atol=1e-5), "mismatch vs reference (B=4096)"

    # Case 3: ragged batch (not a multiple of 16) -> host padding + slice path.
    B3 = 1000
    x3 = jax.random.normal(kx3, (B3, IN), jnp.float32)
    out3 = jax.block_until_ready(model_forward(x3, weight, bias, other, tm=64))
    assert out3.shape == (B3, OUT)
    assert jnp.allclose(out3, ref(x3), atol=1e-5), "mismatch vs reference (B=1000)"

    print("KERNEL_OK")
</pallas_src>

<mosaic_0001>
module attributes {stable_mosaic.version = 11 : i64} {
  func.func @linear_relu_kernel(%arg0: i32, %arg1: memref<128x128xf32, #tpu.memory_space<vmem>>, %arg2: memref<128x128xf32, #tpu.memory_space<vmem>>, %arg3: memref<1x128xf32, #tpu.memory_space<vmem>>, %arg4: memref<128x128xf32, #tpu.memory_space<vmem>>) attributes {dimension_semantics = [#tpu.dimension_semantics<parallel>], iteration_bounds = array<i64: 2>, scalar_prefetch = 0 : i64, scratch_operands = 0 : i64, tpu.core_type = #tpu.core_type<tc>, window_params = [{transform_indices = @transform_0, window_bounds = array<i64: 128, 128>}, {pipeline_mode = #tpu.pipeline_mode<synchronous>, transform_indices = @transform_1, window_bounds = array<i64: 128, 128>}, {pipeline_mode = #tpu.pipeline_mode<synchronous>, transform_indices = @transform_2, window_bounds = array<i64: 1, 128>}, {transform_indices = @transform_3, window_bounds = array<i64: 128, 128>}]} {
    %c0 = arith.constant 0 : index
    %c0_0 = arith.constant 0 : index
    %0 = vector.load %arg1[%c0, %c0_0] : memref<128x128xf32, #tpu.memory_space<vmem>>, vector<128x128xf32>
    %c0_1 = arith.constant 0 : index
    %c0_2 = arith.constant 0 : index
    %1 = vector.load %arg2[%c0_1, %c0_2] : memref<128x128xf32, #tpu.memory_space<vmem>>, vector<128x128xf32>
    %cst = arith.constant dense<0.000000e+00> : vector<128x128xf32>
    %2 = tpu.matmul %0, %1, %cst {dimension_numbers = #tpu.dot_dimension_numbers<[1], [0], [0], [1], [0, 0, 1, 1], [], []>} : vector<128x128xf32>, vector<128x128xf32>, vector<128x128xf32> -> vector<128x128xf32>
    %c0_3 = arith.constant 0 : index
    %c0_4 = arith.constant 0 : index
    %3 = vector.load %arg3[%c0_3, %c0_4] : memref<1x128xf32, #tpu.memory_space<vmem>>, vector<1x128xf32>
    %4 = vector.broadcast %3 : vector<1x128xf32> to vector<128x128xf32>
    %5 = arith.addf %2, %4 : vector<128x128xf32>
    %cst_5 = arith.constant 0.000000e+00 : f32
    %6 = vector.broadcast %cst_5 : f32 to vector<128x128xf32>
    %7 = arith.maximumf %5, %6 : vector<128x128xf32>
    %c0_6 = arith.constant 0 : index
    %c0_7 = arith.constant 0 : index
    %8 = vector.load %arg4[%c0_6, %c0_7] : memref<128x128xf32, #tpu.memory_space<vmem>>, vector<128x128xf32>
    tpu.vector_store %arg4[%c0_6, %c0_7], %7 {strides = array<i32>} : memref<128x128xf32, #tpu.memory_space<vmem>>, vector<128x128xf32>,
    return
  }
  func.func @transform_0(%arg0: i32) -> (i32, i32) {
    %c0_i32 = arith.constant 0 : i32
    %c0_i32_0 = arith.constant 0 : i32
    return %arg0, %c0_i32 : i32, i32
  }
  func.func @transform_1(%arg0: i32) -> (i32, i32) {
    %c0_i32 = arith.constant 0 : i32
    %c0_i32_0 = arith.constant 0 : i32
    %c0_i32_1 = arith.constant 0 : i32
    return %c0_i32, %c0_i32_0 : i32, i32
  }
  func.func @transform_2(%arg0: i32) -> (i32, i32) {
    %c0_i32 = arith.constant 0 : i32
    %c0_i32_0 = arith.constant 0 : i32
    %c0_i32_1 = arith.constant 0 : i32
    return %c0_i32, %c0_i32_0 : i32, i32
  }
  func.func @transform_3(%arg0: i32) -> (i32, i32) {
    %c0_i32 = arith.constant 0 : i32
    %c0_i32_0 = arith.constant 0 : i32
    return %arg0, %c0_i32 : i32, i32
  }
}

</mosaic_0001>

<bundles_post_ra>
// kernel: tpu_custom_call.1
= control target key start
LH: loop header
LB: loop body
LE: loop exit
PB: predicated region body
PF: predicated region fallthrough
CT: control target
= control target key end

     0   :  { %8 = vsyncpa [#allocation3], 0  ;;  %s1097_s0 = inlined_call_operand.hbm [shape: f32[256,128], index: 0, kind: input, shape index: {}]   ;;  %s1098_s1 = inlined_call_operand.hbm [shape: f32[128,128], index: 1, kind: input, shape index: {}]   ;;  %s1099_s2 = inlined_call_operand.vmem [shape: f32[1,128], index: 2, kind: input, shape index: {}]   ;;  %s1100_s3 = inlined_call_operand.hbm [shape: f32[256,128], index: 3, kind: output, shape index: {}]  }
   0x1   :  { %10 = vsyncpa [#allocation3 + $0x1], 0 }
   0x2   :  { %11 = vsyncpa [#allocation6], 0 }
   0x3   :  { %12 = vsyncpa [#allocation4], 0 }
   0x4   :  { %14 = vsyncpa [#allocation4 + $0x1], 0  ;;  %s870_s12 = smov 0   ;;  %s872_s13 = smov 0  }
   0x5   :  { %s874_s14 = smov 0   ;;  %s876_s15 = smov 0  }
   0x6 LB: > { %s891_s16 = sadd.s32 4294967295, %s841_s15   ;;  %s519_s17 = sadd.s32 4294967294, %s841_s15   ;;  %s841_s15 = sphi %s876_s15, %s1122_s15   ;;  %s837_s14 = sphi %s874_s14, %s1121_s14   ;;  %s833_s13 = sphi %s872_s13, %s1120_s13   ;;  %s829_s12 = sphi %s870_s12, %s1119_s12  }
   0x7   : > { %p40_p0 = scmp.ne.s32.totalorder %s833_s13, %s829_s12  ;;  %p1101_p1 = scmp.eq.s32.totalorder %s891_s16, 0 }
   0x8   : > { %p112_p3 = scmp.eq.s32.totalorder %s519_s17, 1  ;;  %p520_p5 = scmp.ge.s32.totalorder %s841_s15, 1 }
   0x9   : > { %p900_p4 = por %p1101_p1, %p40_p0  ;;  %p119_p7 = scmp.lt.s32.totalorder %s841_s15, 3 }
   0xa   : > { %p905_p6 = por %p112_p3, %p40_p0  ;;  %s843_s21 = smov [#allocation5]  }
   0xb   : > { %s1105_s18 = scalar_select %p900_p4, 1, 0 }
   0xc   : > { %s1106_s19 = scalar_select %p905_p6, 1, 0 }
   0xd   : > { %p910_p8 = pnand %p520_p5, %p119_p7  ;;  %s131_s22 = sshll.u32 %s843_s21, 4  ;;  %s132_s22 = int_to_ptr.vmem [resolvable:$true] %s131_s22 }
   0xe   : > { %s924_s24 = sadd.s32 1, %s841_s15   ;;  %s27_s25 = sadd.s32 1, %s837_s14 }
   0xf   : > { %s1107_s20 = scalar_select %p910_p8, 1, 0 }
  0x10   : > { %p666_p9 = pneg %p910_p8  ;;  %s24_s26 = ssub.s32 %s841_s15, %s924_s24 }
  0x11   : > { %s730_s27 = scalar_lea.vmem %s132_s22, 2048  ;;  %p738_p5 = scmp.lt.s32.totalorder %s132_s22, %s132_s22 }
  0x12   : > { %p919_p11 = pnand %p666_p9, %p1101_p1  ;;  %p731_p13 = scmp.ne.s32.totalorder %s132_s22, %s730_s27 }
  0x13   : > { %p739_p7 = scmp.lt.s32.totalorder %s730_s27, %s730_s27 }
  0x14   : > { %p721_p12 = pneg %p919_p11 }
  0x15   : > { %p740_p10 = por %p739_p7, %p738_p5 }
  0x16   : > { %p733_p0 = pnand %p731_p13, %p721_p12 }
  0x18   : > { %p734_p3 = pneg %p733_p0 }
  0x1a   : > { %p741_p2 = pnand %p740_p10, %p734_p3 }
  0x1c   : > { %744 = shalt.err (!%p741_p2)
}
  0x1d   : > { %s844_s28 = smov 128   ;;  %s845_s29 = smov 8  }
  0x1e   : > { %669 = dma.hbm_to_vmem [thread:$0]  (!%p919_p11), %s1098_s1, 2048, %s132_s22, [#allocation6], %s844_s28, %s844_s28, %s845_s29  }
  0x1f   : > { %p25_p2 = scmp.eq.s32.totalorder %s24_s26, 0  ;;  %p34_p9 = scmp.ne.s32.totalorder %s837_s14, %s833_s13 }
  0x20   : > { %p35_p10 = scmp.eq.s32.totalorder %s841_s15, 0  ;;  %p679_p12 = scmp.lt.s32.totalorder %s841_s15, 2 }
  0x21   : > { %s944_s5 = scalar_select %p25_p2, %s837_s14, %s27_s25  }
  0x22   : > { %p36_p13 = por %p35_p10, %p34_p9  ;;  %p1109_p0 = scmp.eq.s32.totalorder %s891_s16, 1 }
  0x23   : > { %s148_s7 = sand.u32 1, %s837_s14   ;;  %s536_s8 = sshll.u32 %s841_s15, 11 }
  0x24   : > { %p948_p3 = por %p1109_p0, %p34_p9  ;;  %s523_s9 = sshll.u32 %s148_s7, 7 }
  0x25   : > { %s957_s17 = scalar_lea.hbm %s1097_s0, %s536_s8  ;;  %s152_s21 = scalar_lea.vmem [#allocation2], %s523_s9 }
  0x26   : > { %s1110_s6 = scalar_select %p948_p3, 1, 0 }
  0x27   : > { %s159_s22 = sshll.u32 %s152_s21, 4  ;;  %p959_p11 = pnand %p679_p12, %p36_p13  ;;  %s963_s22 = int_to_ptr.vmem [resolvable:$true] %s159_s22 }
  0x28   : > { %s965_s25 = scalar_lea.sflag [#allocation3], %s148_s7  ;;  %s745_s26 = scalar_lea.hbm %s957_s17, 2048 }
  0x29   : > { %p746_p5 = scmp.ne.s32.totalorder %s957_s17, %s745_s26  ;;  %p747_p7 = pneg %p959_p11 }
  0x2a   : > { %s750_s4 = scalar_lea.hbm %s1097_s0, 4096  ;;  %p751_p10 = scmp.lt.s32.totalorder %s957_s17, %s1097_s0 }
  0x2b   : > { %p748_p2 = pnand %p747_p7, %p746_p5  ;;  %p752_p12 = scmp.lt.s32.totalorder %s750_s4, %s745_s26 }
  0x2d   : > { %p749_p9 = pneg %p748_p2  ;;  %p753_p13 = por %p752_p12, %p751_p10 }
  0x2f   : > { %p754_p0 = pnand %p753_p13, %p749_p9 }
  0x31   : > { %757 = shalt.err (!%p754_p0)
}
  0x32   : > { %s758_s7 = scalar_lea.vmem %s963_s22, 2048  ;;  %s846_s10 = smov [#allocation2]  }
  0x33   : > { %p759_p1 = scmp.ne.s32.totalorder %s963_s22, %s758_s7  ;;  %s763_s11 = sshll.u32 %s846_s10, 4  ;;  %s764_s11 = int_to_ptr.vmem [resolvable:$false] %s763_s11 }
  0x34   : > { %s765_s21 = scalar_lea.vmem %s764_s11, 4096  ;;  %p766_p2 = scmp.lt.s32.totalorder %s963_s22, %s764_s11 }
  0x35   : > { %p761_p6 = pnand %p759_p1, %p747_p7  ;;  %p767_p3 = scmp.lt.s32.totalorder %s765_s21, %s758_s7 }
  0x37   : > { %p762_p5 = pneg %p761_p6  ;;  %p768_p4 = por %p767_p3, %p766_p2 }
  0x39   : > { %p769_p8 = pnand %p768_p4, %p762_p5 }
  0x3b   : > { %772 = shalt.err (!%p769_p8)
}
  0x3c   : > { %673 = dma.hbm_to_vmem [thread:$0]  (!%p959_p11), %s957_s17, 2048, %s963_s22, %s965_s25, %s844_s28, %s844_s28, %s845_s29  }
  0x3d   : > { %p1112_p1 = scmp.ne.s32.totalorder %s1107_s20, 0 }
  0x3e   : > { %s992_s26 = sand.u32 (!%p1112_p1), 1, %s833_s13   ;;  %p1113_p4 = scmp.ne.s32.totalorder (!%p1112_p1), %s1105_s18, 0 }
  0x3f   : > { %171 = sbr.rel (%p1112_p1) target bundleno = 331 (0x14b), region = 32  ;;  %s527_s27 = sshll.u32 (!%p1112_p1), %s992_s26, 7 }
  0x40   : > { %s174_s30 = scalar_lea.sflag (!%p1112_p1), [#allocation3], %s992_s26  ;;  %s998_s23 = scalar_lea.vmem (!%p1112_p1), [#allocation2], %s527_s27 }
  0x44   : > { %816 = dma.done.wait (%p1113_p4), %s174_s30, 2048  }
  0x45   : > { %818 = vsyncadd (%p1113_p4), %s174_s30, 4294965248  ;;  %p1114_p6 = scmp.eq.s32.totalorder %s891_s16, 0 }
  0x47   : > { %820 = dma.done.wait (%p1114_p6), [#allocation6], 2048   ;;  %p1115_p8 = pmov %p1114_p6 }
  0x48   : > { %v237_v0 = vld [vmem:[#allocation5 + $0x78] sm:$0xff]  ;;  %v236_v1 = vld [vmem:[#allocation5 + $0x70] sm:$0xff]  ;;  %v235_v2 = vld [vmem:[#allocation5 + $0x68] sm:$0xff]  ;;  %s1029_s28 = scalar_lea.vmem [#allocation7], %s527_s27  ;;  %s537_s29 = sshll.u32 %s891_s16, 11 }
  0x49   : > { %822 = vsyncadd (%p1115_p8), [#allocation6], 4294965248  ;;  %570 = vmatprep.subr.mxu0 %v237_v0  ;;  %626 = vmatprep.subr.mxu1 %v237_v0  ;;  %v234_v3 = vld [vmem:[#allocation5 + $0x60] sm:$0xff]  ;;  %v233_v4 = vld [vmem:[#allocation5 + $0x58] sm:$0xff]  ;;  %s436_s17 = sshll.u32 %s1029_s28, 4  ;;  %s1048_s4 = scalar_lea.hbm %s1100_s3, %s537_s29  ;;  %s1050_s17 = int_to_ptr.vmem [resolvable:$true] %s436_s17 }
  0x4a   : > { %571 = vmatpush3.msra.mxu0 %v237_v0  ;;  %642 = vmatpush3.msra.mxu1 %v237_v0  ;;  %v232_v5 = vld [vmem:[#allocation5 + $0x50] sm:$0xff]  ;;  %v231_v6 = vld [vmem:[#allocation5 + $0x48] sm:$0xff]  ;;  %v230_v7 = vld [vmem:[#allocation5 + $0x40] sm:$0xff]  ;;  %s423_s16 = scalar_lea.sflag [#allocation4], %s992_s26  ;;  %s773_s8 = scalar_lea.vmem %s1050_s17, 2048 }
  0x4b   : > { %572 = vmatprep.subr.mxu0 %v236_v1  ;;  %627 = vmatprep.subr.mxu1 %v236_v1  ;;  %v229_v8 = vld [vmem:[#allocation5 + $0x38] sm:$0xff]  ;;  %v228_v9 = vld [vmem:[#allocation5 + $0x30] sm:$0xff]  ;;  %v227_v10 = vld [vmem:[#allocation5 + $0x28] sm:$0xff]  ;;  %p774_p3 = scmp.ne.s32.totalorder %s1050_s17, %s773_s8  ;;  %p1116_p11 = scmp.ne.s32.totalorder %s1110_s6, 0 }
  0x4c   : > { %573 = vmatpush3.msra.mxu0 %v236_v1  ;;  %643 = vmatpush3.msra.mxu1 %v236_v1  ;;  %v226_v11 = vld [vmem:[#allocation5 + $0x20] sm:$0xff]  ;;  %v225_v12 = vld [vmem:[#allocation5 + $0x18] sm:$0xff]  ;;  %v224_v13 = vld [vmem:[#allocation5 + $0x10] sm:$0xff]  ;;  %s847_s9 = smov [#allocation7]  }
  0x4d   : > { %574 = vmatprep.subr.mxu0 %v235_v2  ;;  %628 = vmatprep.subr.mxu1 %v235_v2  ;;  %v223_v14 = vld [vmem:[#allocation5 + $0x8] sm:$0xff]  ;;  %v222_v15 = vld [vmem:[#allocation5] sm:$0xff]  ;;  %v208_v20 = vld [vmem:[%s998_s23 + $0x10] sm:$0xff]  ;;  %p775_p7 = pnand %p774_p3, %p1116_p11  ;;  %s777_s7 = sshll.u32 %s847_s9, 4  ;;  %s778_s7 = int_to_ptr.vmem [resolvable:$false] %s777_s7 }
  0x4e   : > { %575 = vmatpush3.msra.mxu0 %v235_v2  ;;  %644 = vmatpush3.msra.mxu1 %v235_v2  ;;  %v206_v16 = vld [vmem:[%s998_s23] sm:$0xff]  ;;  %v207_v18 = vld [vmem:[%s998_s23 + $0x8] sm:$0xff]  ;;  %v216_v21 = vld [vmem:[%s998_s23 + $0x50] sm:$0xff]  ;;  %s779_s10 = scalar_lea.vmem %s778_s7, 4096  ;;  %p780_p10 = scmp.lt.s32.totalorder %s1050_s17, %s778_s7 }
  0x4f   : > { %576 = vmatprep.subr.mxu0 %v234_v3  ;;  %629 = vmatprep.subr.mxu1 %v234_v3  ;;  %v214_v17 = vld [vmem:[%s998_s23 + $0x40] sm:$0xff]  ;;  %v215_v19 = vld [vmem:[%s998_s23 + $0x48] sm:$0xff]  ;;  %v209_v22 = vld [vmem:[%s998_s23 + $0x18] sm:$0xff]  ;;  %p776_p9 = pneg %p775_p7  ;;  %p781_p12 = scmp.lt.s32.totalorder %s779_s10, %s773_s8 }
  0x50   : > { %577 = vmatpush3.msra.mxu0 %v234_v3  ;;  %645 = vmatpush3.msra.mxu1 %v234_v3  ;;  %v217_v23 = vld [vmem:[%s998_s23 + $0x58] sm:$0xff]  ;;  %v210_v24 = vld [vmem:[%s998_s23 + $0x20] sm:$0xff]  ;;  %v211_v26 = vld [vmem:[%s998_s23 + $0x28] sm:$0xff] }
  0x51   : > { %578 = vmatprep.subr.mxu0 %v233_v4  ;;  %630 = vmatprep.subr.mxu1 %v233_v4  ;;  %v218_v25 = vld [vmem:[%s998_s23 + $0x60] sm:$0xff]  ;;  %v219_v27 = vld [vmem:[%s998_s23 + $0x68] sm:$0xff]  ;;  %v212_v28 = vld [vmem:[%s998_s23 + $0x30] sm:$0xff]  ;;  %p782_p13 = por %p781_p12, %p780_p10 }
  0x52   : > { %579 = vmatpush3.msra.mxu0 %v233_v4  ;;  %646 = vmatpush3.msra.mxu1 %v233_v4  ;;  %v220_v29 = vld [vmem:[%s998_s23 + $0x70] sm:$0xff]  ;;  %v213_v30 = vld [vmem:[%s998_s23 + $0x38] sm:$0xff]  ;;  %v530_v32 = vld [vmem:[%s1099_s2] ss:$0 sm:$0xff] }
  0x53   : > { %580 = vmatprep.subr.mxu0 %v232_v5  ;;  %631 = vmatprep.subr.mxu1 %v232_v5  ;;  %v221_v31 = vld [vmem:[%s998_s23 + $0x78] sm:$0xff]  ;;  %p783_p0 = pnand %p782_p13, %p776_p9 }
  0x54   : > { %581 = vmatpush3.msra.mxu0 %v232_v5  ;;  %647 = vmatpush3.msra.mxu1 %v232_v5 }
  0x55   : > { %582 = vmatprep.subr.mxu0 %v231_v6  ;;  %632 = vmatprep.subr.mxu1 %v231_v6 }
  0x56   : > { %583 = vmatpush3.msra.mxu0 %v231_v6  ;;  %648 = vmatpush3.msra.mxu1 %v231_v6 }
  0x57   : > { %584 = vmatprep.subr.mxu0 %v230_v7  ;;  %633 = vmatprep.subr.mxu1 %v230_v7 }
  0x58   : > { %585 = vmatpush3.msra.mxu0 %v230_v7  ;;  %649 = vmatpush3.msra.mxu1 %v230_v7 }
  0x59   : > { %586 = vmatprep.subr.mxu0 %v229_v8  ;;  %634 = vmatprep.subr.mxu1 %v229_v8 }
  0x5a   : > { %587 = vmatpush3.msra.mxu0 %v229_v8  ;;  %650 = vmatpush3.msra.mxu1 %v229_v8 }
  0x5b   : > { %588 = vmatprep.subr.mxu0 %v228_v9  ;;  %635 = vmatprep.subr.mxu1 %v228_v9 }
  0x5c   : > { %589 = vmatpush3.msra.mxu0 %v228_v9  ;;  %651 = vmatpush3.msra.mxu1 %v228_v9 }
  0x5d   : > { %590 = vmatprep.subr.mxu0 %v227_v10  ;;  %636 = vmatprep.subr.mxu1 %v227_v10 }
  0x5e   : > { %591 = vmatpush3.msra.mxu0 %v227_v10  ;;  %652 = vmatpush3.msra.mxu1 %v227_v10 }
  0x5f   : > { %592 = vmatprep.subr.mxu0 %v226_v11  ;;  %637 = vmatprep.subr.mxu1 %v226_v11 }
  0x60   : > { %593 = vmatpush3.msra.mxu0 %v226_v11  ;;  %653 = vmatpush3.msra.mxu1 %v226_v11 }
  0x61   : > { %594 = vmatprep.subr.mxu0 %v225_v12  ;;  %638 = vmatprep.subr.mxu1 %v225_v12 }
  0x62   : > { %595 = vmatpush3.msra.mxu0 %v225_v12  ;;  %654 = vmatpush3.msra.mxu1 %v225_v12 }
  0x63   : > { %596 = vmatprep.subr.mxu0 %v224_v13  ;;  %639 = vmatprep.subr.mxu1 %v224_v13 }
  0x64   : > { %597 = vmatpush3.msra.mxu0 %v224_v13  ;;  %655 = vmatpush3.msra.mxu1 %v224_v13 }
  0x65   : > { %598 = vmatprep.subr.mxu0 %v223_v14  ;;  %640 = vmatprep.subr.mxu1 %v223_v14 }
  0x66   : > { %599 = vmatpush3.msra.mxu0 %v223_v14  ;;  %656 = vmatpush3.msra.mxu1 %v223_v14 }
  0x67   : > { %600 = vmatprep.subr.mxu0 %v222_v15  ;;  %641 = vmatprep.subr.mxu1 %v222_v15 }
  0x68   : > { %601 = vmatpush3.msra.mxu0 %v222_v15  ;;  %657 = vmatpush3.msra.mxu1 %v222_v15 }
  0x69   : > { %602 = vmatprep.mubr.f32.mxu0 %v206_v16  ;;  %614 = vmatprep.mubr.f32.mxu1 %v214_v17 }
  0x6a   : > { %603 = vmatmul.mubr.f32.vlgmr.msra.gmra.mxu0 %v207_v18  ;;  %615 = vmatmul.mubr.f32.vlgmr.msra.gmra.mxu1 %v215_v19 }
  0x6b   : > { %605 = vmatprep.mubr.f32.mxu0 %v208_v20  ;;  %617 = vmatprep.mubr.f32.mxu1 %v216_v21 }
  0x6e   : > { %606 = vmatmul.mubr.f32.gmra.mxu0 %v209_v22  ;;  %618 = vmatmul.mubr.f32.gmra.mxu1 %v217_v23 }
  0x6f   : > { %608 = vmatprep.mubr.f32.mxu0 %v210_v24  ;;  %620 = vmatprep.mubr.f32.mxu1 %v218_v25 }
  0x72   : > { %609 = vmatmul.mubr.f32.gmra.mxu0 %v211_v26  ;;  %621 = vmatmul.mubr.f32.gmra.mxu1 %v219_v27 }
  0x73   : > { %611 = vmatprep.mubr.f32.mxu0 %v212_v28  ;;  %623 = vmatprep.mubr.f32.mxu1 %v220_v29 }
  0x76   : > { %612 = vmatmul.mubr.f32.gmra.mxu0 %v213_v30  ;;  %624 = vmatmul.mubr.f32.gmra.mxu1 %v221_v31 }
 0x12a   : > { %v604_v33 = vpop.f32.mrf.mxu0  ;;  %v616_v34 = vpop.f32.mrf.mxu1 }
 0x12b   : > { %v317_v35 = vadd.f32 %v604_v33, %v530_v32  ;;  %v357_v36 = vadd.f32 %v616_v34, %v530_v32 }
 0x12c   : > { %v311_v37 = vpop.f32.mrf.mxu0  ;;  %v351_v38 = vpop.f32.mrf.mxu1 }
 0x12d   : > { %v391_v39 = vmax.f32 %v317_v35, 0.0  ;;  %v399_v40 = vmax.f32 %v357_v36, 0.0  ;;  %v312_v41 = vadd.f32 %v530_v32, %v311_v37  ;;  %v352_v42 = vadd.f32 %v530_v32, %v351_v38 }
 0x12e   : > { %v607_v43 = vpop.f32.mrf.mxu0  ;;  %v619_v44 = vpop.f32.mrf.mxu1 }
 0x12f   : > { %407 = vst [vmem:[%s1029_s28 + $0x8] sm:$0xff] %v391_v39  ;;  %415 = vst [vmem:[%s1029_s28 + $0x48] sm:$0xff] %v399_v40  ;;  %v390_v45 = vmax.f32 %v312_v41, 0.0  ;;  %v398_v46 = vmax.f32 %v352_v42, 0.0  ;;  %v327_v47 = vadd.f32 %v607_v43, %v530_v32  ;;  %v367_v48 = vadd.f32 %v619_v44, %v530_v32 }
 0x130   : > { %v321_v49 = vpop.f32.mrf.mxu0  ;;  %v361_v50 = vpop.f32.mrf.mxu1 }
 0x131   : > { %406 = vst [vmem:[%s1029_s28] sm:$0xff] %v390_v45  ;;  %414 = vst [vmem:[%s1029_s28 + $0x40] sm:$0xff] %v398_v46  ;;  %v393_v51 = vmax.f32 %v327_v47, 0.0  ;;  %v401_v52 = vmax.f32 %v367_v48, 0.0  ;;  %v322_v53 = vadd.f32 %v530_v32, %v321_v49  ;;  %v362_v54 = vadd.f32 %v530_v32, %v361_v50 }
 0x132   : > { %v610_v55 = vpop.f32.mrf.mxu0  ;;  %v622_v56 = vpop.f32.mrf.mxu1 }
 0x133   : > { %409 = vst [vmem:[%s1029_s28 + $0x18] sm:$0xff] %v393_v51  ;;  %417 = vst [vmem:[%s1029_s28 + $0x58] sm:$0xff] %v401_v52  ;;  %v392_v57 = vmax.f32 %v322_v53, 0.0  ;;  %v400_v58 = vmax.f32 %v362_v54, 0.0  ;;  %v337_v59 = vadd.f32 %v610_v55, %v530_v32  ;;  %v377_v60 = vadd.f32 %v622_v56, %v530_v32 }
 0x134   : > { %v331_v61 = vpop.f32.mrf.mxu0  ;;  %v371_v62 = vpop.f32.mrf.mxu1 }
 0x135   : > { %408 = vst [vmem:[%s1029_s28 + $0x10] sm:$0xff] %v392_v57  ;;  %416 = vst [vmem:[%s1029_s28 + $0x50] sm:$0xff] %v400_v58  ;;  %v395_v63 = vmax.f32 %v337_v59, 0.0  ;;  %v403_v0 = vmax.f32 %v377_v60, 0.0  ;;  %v332_v1 = vadd.f32 %v530_v32, %v331_v61  ;;  %v372_v2 = vadd.f32 %v530_v32, %v371_v62 }
 0x136   : > { %v613_v3 = vpop.f32.mrf.mxu0  ;;  %v625_v4 = vpop.f32.mrf.mxu1 }
 0x137   : > { %411 = vst [vmem:[%s1029_s28 + $0x28] sm:$0xff] %v395_v63  ;;  %419 = vst [vmem:[%s1029_s28 + $0x68] sm:$0xff] %v403_v0  ;;  %v394_v5 = vmax.f32 %v332_v1, 0.0  ;;  %v402_v6 = vmax.f32 %v372_v2, 0.0  ;;  %v347_v7 = vadd.f32 %v613_v3, %v530_v32  ;;  %v387_v8 = vadd.f32 %v625_v4, %v530_v32 }
 0x138   : > { %v341_v9 = vpop.f32.mrf.mxu0  ;;  %v381_v10 = vpop.f32.mrf.mxu1 }
 0x139   : > { %410 = vst [vmem:[%s1029_s28 + $0x20] sm:$0xff] %v394_v5  ;;  %418 = vst [vmem:[%s1029_s28 + $0x60] sm:$0xff] %v402_v6  ;;  %v397_v11 = vmax.f32 %v347_v7, 0.0  ;;  %v405_v12 = vmax.f32 %v387_v8, 0.0  ;;  %v342_v13 = vadd.f32 %v530_v32, %v341_v9  ;;  %v382_v14 = vadd.f32 %v530_v32, %v381_v10 }
 0x13b   : > { %413 = vst [vmem:[%s1029_s28 + $0x38] sm:$0xff] %v397_v11  ;;  %421 = vst [vmem:[%s1029_s28 + $0x78] sm:$0xff] %v405_v12  ;;  %v396_v15 = vmax.f32 %v342_v13, 0.0  ;;  %v404_v16 = vmax.f32 %v382_v14, 0.0 }
 0x13d   : > { %412 = vst [vmem:[%s1029_s28 + $0x30] sm:$0xff] %v396_v15  ;;  %420 = vst [vmem:[%s1029_s28 + $0x70] sm:$0xff] %v404_v16 }
 0x13e   : > { %786 = shalt.err (!%p783_p0)
}
 0x13f   : > { %s787_s11 = scalar_lea.hbm %s1048_s4, 2048  ;;  %s791_s30 = scalar_lea.hbm %s1100_s3, 4096 }
 0x140   : > { %p788_p5 = scmp.ne.s32.totalorder %s1048_s4, %s787_s11  ;;  %p792_p4 = scmp.lt.s32.totalorder %s1048_s4, %s1100_s3 }
 0x141   : > { %p793_p6 = scmp.lt.s32.totalorder %s791_s30, %s787_s11 }
 0x142   : > { %p789_p2 = pnand %p788_p5, %p1116_p11 }
 0x143   : > { %p794_p8 = por %p793_p6, %p792_p4 }
 0x144   : > { %p790_p1 = pneg %p789_p2 }
 0x146   : > { %p795_p3 = pnand %p794_p8, %p790_p1 }
 0x148   : > { %798 = shalt.err (!%p795_p3)
}
 0x149   : > { %s848_s20 = smov 128   ;;  %s849_s28 = smov 8  }
 0x14a   : > { %664 = dma.vmem_to_hbm [thread:$0]  (%p1116_p11), %s1050_s17, 2048, %s1048_s4, %s423_s16, %s848_s20, %s848_s20, %s849_s28  }
 0x14b PF: > { %s451_s29 = sand.u32 1, %s829_s12   ;;  %p1117_p7 = scmp.ne.s32.totalorder %s1106_s19, 0 }
 0x14c   : > { %p1118_p9 = scmp.ge.s32.totalorder %s841_s15, 2  ;;  %s452_s22 = scalar_lea.sflag [#allocation4], %s451_s29 }
 0x14e   : > { %p675_p10 = pnand %p1118_p9, %p1117_p7 }
 0x150   : > { %p676_p12 = pneg %p675_p10 }
 0x152   : > { %824 = dma.done.wait (%p676_p12), %s452_s22, 2048  }
 0x153   : > { %826 = vsyncadd (%p676_p12), %s452_s22, 4294965248  ;;  %p17_p13 = scmp.ge.s32.totalorder %s924_s24, 4   ;;  %s1119_s12 = smov %s833_s13 }
 0x154   : > { %s1120_s13 = smov %s837_s14  ;;  %s1121_s14 = smov %s944_s5 }
 0x155   : > { %s1122_s15 = smov %s924_s24  ;;  %19 = sbr.rel (!%p17_p13) target bundleno = 6 (0x6), region = 81 }
 0x15a   :  { %457 = vsyncpa [#allocation3], 1 }
 0x15b   :  { %459 = vsyncpa [#allocation3 + $0x1], 1 }
 0x15c   :  { %460 = vsyncpa [#allocation6], 1 }
 0x15d   :  { %461 = vsyncpa [#allocation4], 1 }
 0x15e   :  { %463 = vsyncpa [#allocation4 + $0x1], 1 }

</bundles_post_ra>
